<compile_context>
chip_gen: v5e
topology: v5e:2x2
jax: 0.10.0
libtpu: 0.0.40
codegen_flags: <defaults>
</compile_context>

<pallas_src>
import jax
import jax.numpy as jnp
from jax import lax
from jax.experimental import pallas as pl
from jax.experimental.pallas import tpu as pltpu


def _pick_tiles(hw, c, itemsize, target_block_bytes):
    """Choose (ts_chunk, ts_block, n_chunks) for the spatial (lane) axis."""
    # Chunk: keep the ~10 live (C, chunk) f32 temporaries of the per-chunk
    # softmax/KL chain roughly inside the 64-vreg register file (avoid spills).
    c_sub_tiles = -(-c // 8)                        # ceil(c / 8) sublane tiles (f32)
    ts_chunk = 128 * max(1, 4 // c_sub_tiles)       # 512 cols for c<=8, 128 for big c

    # Block: ~target_block_bytes of (sublane-padded) VMEM per input buffer so the
    # ~0.35us per-grid-step overhead and DMA latency are amortised; must be a
    # multiple of ts_chunk (hence of 128 lanes).
    sub = max(1, 32 // itemsize)                    # sublane packing: 8 f32 / 16 bf16
    c_pad = -(-c // sub) * sub
    ts_block = (target_block_bytes // (c_pad * itemsize)) // ts_chunk * ts_chunk
    ts_block = max(ts_chunk, ts_block)

    if hw <= ts_block:
        # Whole spatial extent in one block: single chunk, no tail masking needed.
        return hw, hw, 1
    return ts_chunk, ts_block, ts_block // ts_chunk


def _make_kl_kernel(c, ts_block, ts_chunk, n_chunks, hw, needs_mask):
    """Per-image partial sums of softmax(t)*(log_softmax(t)-log_softmax(s))."""

    def kernel(s_ref, t_ref, o_ref, acc_ref):
        # s_ref/t_ref: (C, ts_block) logit slab; o_ref: (1, 128); acc: (1, ts_chunk)
        j = pl.program_id(1)

        @pl.when(j == 0)
        def _():
            acc_ref[...] = jnp.zeros_like(acc_ref)

        def chunk_body(off):
            s = s_ref[:, pl.ds(off, ts_chunk)].astype(jnp.float32)   # (C, chunk)
            t = t_ref[:, pl.ds(off, ts_chunk)].astype(jnp.float32)

            # Channel (sublane) reductions on fully lane-dense vregs.
            s_max = jnp.max(s, axis=0, keepdims=True)                # (1, chunk)
            t_max = jnp.max(t, axis=0, keepdims=True)
            s_sh = s - s_max
            t_sh = t - t_max
            s_sum = jnp.sum(jnp.exp(s_sh), axis=0, keepdims=True)
            t_exp = jnp.exp(t_sh)
            t_sum = jnp.sum(t_exp, axis=0, keepdims=True)

            # sum_c softmax(t)*(log_softmax(t)-log_softmax(s))
            #   = (1/t_sum) * sum_c t_exp * ((t_sh - s_sh) + log(s_sum/t_sum))
            # t_exp underflow -> term is exactly 0 (matches xlogy semantics), so
            # no where-guard is needed on the valid lanes.
            inv_t = pl.reciprocal(t_sum, approx=True)                # EUP seed
            inv_t = inv_t * (2.0 - t_sum * inv_t)                    # Newton refine
            log_const = jnp.log(s_sum * inv_t)                       # (1, chunk)
            num = jnp.sum(t_exp * ((t_sh - s_sh) + log_const),
                          axis=0, keepdims=True)
            kl = num * inv_t                                         # (1, chunk)

            if needs_mask:
                col = (j * ts_block + off
                       + lax.broadcasted_iota(jnp.int32, (1, ts_chunk), 1))
                kl = jnp.where(col < hw, kl, 0.0)

            acc_ref[...] += kl                                       # per-lane partials

        if n_chunks == 1:
            chunk_body(0)
        else:
            def loop_body(k, carry):
                chunk_body(pl.multiple_of(k * ts_chunk, 128))
                return carry
            lax.fori_loop(0, n_chunks, loop_body, None)

        @pl.when(j == pl.num_programs(1) - 1)
        def _():
            # Single cross-lane reduce per batch image; lane-dense (1,128) store.
            total = jnp.sum(acc_ref[...])
            o_ref[...] = jnp.broadcast_to(total, o_ref.shape)

    return kernel


def criterion_kl_divergence(s_feature, t_feature, *,
                            target_block_bytes=2 * 1024 * 1024):
    """JAX/Pallas equivalent of CriterionKlDivergence.forward.

    loss = mean over all elements of
           softmax(t, dim=1) * (log_softmax(t, dim=1) - log_softmax(s, dim=1))
    i.e. nn.KLDivLoss() (default reduction='mean') applied to
    (F.log_softmax(s), F.softmax(t)) with the implicit dim=1 of 4-D inputs.
    Inputs may be f32 or bf16 (kernel computes in f32 internally).
    """
    assert s_feature.ndim == 4 and t_feature.ndim == 4
    N, C, H, W = s_feature.shape
    assert t_feature.shape[0] == N
    assert t_feature.shape[2] == H and t_feature.shape[3] == W
    assert t_feature.shape[1] == C   # softmax axes must match for KL

    HW = H * W
    # Free reshapes of contiguous NCHW -- no transpose, no extra HBM pass.
    s3 = s_feature.reshape(N, C, HW)
    t3 = t_feature.reshape(N, C, HW)

    itemsize = jnp.dtype(s_feature.dtype).itemsize
    ts_chunk, ts_block, n_chunks = _pick_tiles(HW, C, itemsize, target_block_bytes)
    n_sblocks = -(-HW // ts_block)
    needs_mask = (HW % ts_block) != 0

    kernel = _make_kl_kernel(C, ts_block, ts_chunk, n_chunks, HW, needs_mask)

    partials = pl.pallas_call(
        kernel,
        out_shape=jax.ShapeDtypeStruct((N, 1, 128), jnp.float32),
        grid_spec=pltpu.PrefetchScalarGridSpec(
            num_scalar_prefetch=0,
            grid=(N, n_sblocks),
            in_specs=[
                pl.BlockSpec((None, C, ts_block), lambda n, j: (n, 0, j)),
                pl.BlockSpec((None, C, ts_block), lambda n, j: (n, 0, j)),
            ],
            out_specs=pl.BlockSpec((None, 1, 128), lambda n, j: (n, 0, 0)),
            scratch_shapes=[pltpu.VMEM((1, ts_chunk), jnp.float32)],
        ),
        compiler_params=pltpu.CompilerParams(
            # Batch axis shards across TensorCores (v7x megacore); the spatial
            # block axis is the per-image reduction and stays 'arbitrary'.
            dimension_semantics=("parallel", "arbitrary"),
            vmem_limit_bytes=32 * 1024 * 1024,
        ),
    )(s3, t3)

    loss = jnp.sum(partials[:, 0, 0]) / jnp.float32(N * C * H * W)
    return dict(loss=loss)


def _reference_loss(s_feature, t_feature):
    """Pure-JAX reference for verification."""
    log_s = jax.nn.log_softmax(s_feature, axis=1)
    t_sm = jax.nn.softmax(t_feature, axis=1)
    log_t = jax.nn.log_softmax(t_feature, axis=1)
    pw = jnp.where(t_sm > 0, t_sm * (log_t - log_s), 0.0)
    return jnp.mean(pw)


if __name__ == "__main__":
    key = jax.random.PRNGKey(0)
    k1, k2 = jax.random.split(key)

    # Primary small shape implied by the module: NCHW feature maps.
    N, C, H, W = 2, 4, 16, 16
    s_feature = jax.random.normal(k1, (N, C, H, W), dtype=jnp.float32)
    t_feature = jax.random.normal(k2, (N, C, H, W), dtype=jnp.float32)

    out = criterion_kl_divergence(s_feature, t_feature)
    loss = jax.block_until_ready(out["loss"])
    ref = jax.block_until_ready(_reference_loss(s_feature, t_feature))
    assert jnp.allclose(loss, ref, rtol=1e-4, atol=1e-6), (loss, ref)

    # Exercise the multi-block / in-kernel chunk-loop / ragged-tail path that
    # large real feature maps hit, by forcing a tiny block size.
    k3, k4 = jax.random.split(k2)
    s2 = jax.random.normal(k3, (2, 4, 40, 40), dtype=jnp.float32)
    t2 = jax.random.normal(k4, (2, 4, 40, 40), dtype=jnp.float32)
    out2 = criterion_kl_divergence(s2, t2, target_block_bytes=32 * 1024)
    loss2 = jax.block_until_ready(out2["loss"])
    ref2 = jax.block_until_ready(_reference_loss(s2, t2))
    assert jnp.allclose(loss2, ref2, rtol=1e-4, atol=1e-6), (loss2, ref2)

    print("KERNEL_OK")
</pallas_src>

<mosaic_0001>
module attributes {stable_mosaic.version = 11 : i64} {
  func.func @kernel(%arg0: i32, %arg1: i32, %arg2: memref<1x4x256xf32, #tpu.memory_space<vmem>>, %arg3: memref<1x4x256xf32, #tpu.memory_space<vmem>>, %arg4: memref<1x1x128xf32, #tpu.memory_space<vmem>>, %arg5: memref<1x256xf32, #tpu.memory_space<vmem>>) attributes {dimension_semantics = [#tpu.dimension_semantics<parallel>, #tpu.dimension_semantics<arbitrary>], iteration_bounds = array<i64: 2, 1>, scalar_prefetch = 0 : i64, scratch_operands = 1 : i64, tpu.core_type = #tpu.core_type<tc>, window_params = [{transform_indices = @transform_0, window_bounds = array<i64: 1, 4, 256>}, {transform_indices = @transform_1, window_bounds = array<i64: 1, 4, 256>}, {transform_indices = @transform_2, window_bounds = array<i64: 1, 1, 128>}]} {
    %c0_i32 = arith.constant 0 : i32
    %0 = arith.cmpi eq, %arg1, %c0_i32 : i32
    %1 = arith.extui %0 : i1 to i32
    %c0_i32_0 = arith.constant 0 : i32
    %2 = arith.cmpi ne, %1, %c0_i32_0 : i32
    scf.if %2 {
      %cst_17 = arith.constant 0.000000e+00 : f32
      %41 = vector.broadcast %cst_17 : f32 to vector<1x256xf32>
      %c0_18 = arith.constant 0 : index
      %c0_19 = arith.constant 0 : index
      %42 = vector.load %arg5[%c0_18, %c0_19] : memref<1x256xf32, #tpu.memory_space<vmem>>, vector<1x256xf32>
      tpu.vector_store %arg5[%c0_18, %c0_19], %41 {strides = array<i32>} : memref<1x256xf32, #tpu.memory_space<vmem>>, vector<1x256xf32>,
    } else {
    }
    %c0 = arith.constant 0 : index
    %c0_1 = arith.constant 0 : index
    %c0_2 = arith.constant 0 : index
    %3 = vector.load %arg2[%c0, %c0_1, %c0_2] : memref<1x4x256xf32, #tpu.memory_space<vmem>>, vector<1x4x256xf32>
    %4 = vector.shape_cast %3 : vector<1x4x256xf32> to vector<4x256xf32>
    %c0_3 = arith.constant 0 : index
    %c0_4 = arith.constant 0 : index
    %c0_5 = arith.constant 0 : index
    %5 = vector.load %arg3[%c0_3, %c0_4, %c0_5] : memref<1x4x256xf32, #tpu.memory_space<vmem>>, vector<1x4x256xf32>
    %6 = vector.shape_cast %5 : vector<1x4x256xf32> to vector<4x256xf32>
    %cst = arith.constant dense<0xFF800000> : vector<256xf32>
    %7 = vector.multi_reduction <maximumf>, %4, %cst [0] : vector<4x256xf32> to vector<256xf32>
    %8 = vector.shape_cast %7 : vector<256xf32> to vector<1x256xf32>
    %cst_6 = arith.constant dense<0xFF800000> : vector<256xf32>
    %9 = vector.multi_reduction <maximumf>, %6, %cst_6 [0] : vector<4x256xf32> to vector<256xf32>
    %10 = vector.shape_cast %9 : vector<256xf32> to vector<1x256xf32>
    %11 = vector.broadcast %8 : vector<1x256xf32> to vector<4x256xf32>
    %12 = arith.subf %4, %11 : vector<4x256xf32>
    %13 = vector.broadcast %10 : vector<1x256xf32> to vector<4x256xf32>
    %14 = arith.subf %6, %13 : vector<4x256xf32>
    %15 = math.exp %12 : vector<4x256xf32>
    %cst_7 = arith.constant dense<0.000000e+00> : vector<256xf32>
    %16 = vector.multi_reduction <add>, %15, %cst_7 [0] : vector<4x256xf32> to vector<256xf32>
    %17 = vector.shape_cast %16 : vector<256xf32> to vector<1x256xf32>
    %18 = math.exp %14 : vector<4x256xf32>
    %cst_8 = arith.constant dense<0.000000e+00> : vector<256xf32>
    %19 = vector.multi_reduction <add>, %18, %cst_8 [0] : vector<4x256xf32> to vector<256xf32>
    %20 = vector.shape_cast %19 : vector<256xf32> to vector<1x256xf32>
    %21 = tpu.reciprocal %20 {approx = true} : vector<1x256xf32> -> vector<1x256xf32>
    %22 = arith.mulf %20, %21 : vector<1x256xf32>
    %cst_9 = arith.constant 2.000000e+00 : f32
    %23 = vector.broadcast %cst_9 : f32 to vector<1x256xf32>
    %24 = arith.subf %23, %22 : vector<1x256xf32>
    %25 = arith.mulf %21, %24 : vector<1x256xf32>
    %26 = arith.mulf %17, %25 : vector<1x256xf32>
    %27 = math.log %26 : vector<1x256xf32>
    %28 = arith.subf %14, %12 : vector<4x256xf32>
    %29 = vector.broadcast %27 : vector<1x256xf32> to vector<4x256xf32>
    %30 = arith.addf %28, %29 : vector<4x256xf32>
    %31 = arith.mulf %18, %30 : vector<4x256xf32>
    %cst_10 = arith.constant dense<0.000000e+00> : vector<256xf32>
    %32 = vector.multi_reduction <add>, %31, %cst_10 [0] : vector<4x256xf32> to vector<256xf32>
    %33 = vector.shape_cast %32 : vector<256xf32> to vector<1x256xf32>
    %34 = arith.mulf %33, %25 : vector<1x256xf32>
    %c0_11 = arith.constant 0 : index
    %c0_12 = arith.constant 0 : index
    %35 = vector.load %arg5[%c0_11, %c0_12] : memref<1x256xf32, #tpu.memory_space<vmem>>, vector<1x256xf32>
    %36 = arith.addf %35, %34 : vector<1x256xf32>
    %c0_13 = arith.constant 0 : index
    %c0_14 = arith.constant 0 : index
    %37 = vector.load %arg5[%c0_13, %c0_14] : memref<1x256xf32, #tpu.memory_space<vmem>>, vector<1x256xf32>
    tpu.vector_store %arg5[%c0_13, %c0_14], %36 {strides = array<i32>} : memref<1x256xf32, #tpu.memory_space<vmem>>, vector<1x256xf32>,
    %c0_i32_15 = arith.constant 0 : i32
    %38 = arith.cmpi eq, %arg1, %c0_i32_15 : i32
    %39 = arith.extui %38 : i1 to i32
    %c0_i32_16 = arith.constant 0 : i32
    %40 = arith.cmpi ne, %39, %c0_i32_16 : i32
    scf.if %40 {
      %c0_17 = arith.constant 0 : index
      %c0_18 = arith.constant 0 : index
      %41 = vector.load %arg5[%c0_17, %c0_18] : memref<1x256xf32, #tpu.memory_space<vmem>>, vector<1x256xf32>
      %42 = vector.shape_cast %41 : vector<1x256xf32> to vector<1x1x256xf32>
      %cst_19 = arith.constant dense<0.000000e+00> : vector<1xf32>
      %43 = vector.multi_reduction <add>, %42, %cst_19 [1, 2] : vector<1x1x256xf32> to vector<1xf32>
      %44 = vector.shape_cast %43 : vector<1xf32> to vector<1x1x1xf32>
      %45 = vector.extract %44[0, 0, 0] : f32 from vector<1x1x1xf32>
      %46 = vector.broadcast %45 : f32 to vector<1x128xf32>
      %c0_20 = arith.constant 0 : index
      %c0_21 = arith.constant 0 : index
      %c0_22 = arith.constant 0 : index
      %47 = vector.load %arg4[%c0_20, %c0_21, %c0_22] : memref<1x1x128xf32, #tpu.memory_space<vmem>>, vector<1x1x128xf32>
      %48 = vector.shape_cast %47 : vector<1x1x128xf32> to vector<1x128xf32>
      %49 = vector.shape_cast %46 : vector<1x128xf32> to vector<1x1x128xf32>
      tpu.vector_store %arg4[%c0_20, %c0_21, %c0_22], %49 {strides = array<i32>} : memref<1x1x128xf32, #tpu.memory_space<vmem>>, vector<1x1x128xf32>,
    } else {
    }
    return
  }
  func.func @transform_0(%arg0: i32, %arg1: i32) -> (i32, i32, i32) {
    %c0_i32 = arith.constant 0 : i32
    %c0_i32_0 = arith.constant 0 : i32
    return %arg0, %c0_i32, %arg1 : i32, i32, i32
  }
  func.func @transform_1(%arg0: i32, %arg1: i32) -> (i32, i32, i32) {
    %c0_i32 = arith.constant 0 : i32
    %c0_i32_0 = arith.constant 0 : i32
    return %arg0, %c0_i32, %arg1 : i32, i32, i32
  }
  func.func @transform_2(%arg0: i32, %arg1: i32) -> (i32, i32, i32) {
    %c0_i32 = arith.constant 0 : i32
    %c0_i32_0 = arith.constant 0 : i32
    %c0_i32_1 = arith.constant 0 : i32
    return %arg0, %c0_i32, %c0_i32_0 : i32, i32, i32
  }
}

</mosaic_0001>

<bundles_post_ra>
// kernel: tpu_custom_call.1
= control target key start
LH: loop header
LB: loop body
LE: loop exit
PB: predicated region body
PF: predicated region fallthrough
CT: control target
= control target key end

     0   :  { %7 = vsyncpa [#allocation4], 0  ;;  %s944_s0 = inlined_call_operand.hbm [shape: f32[2,4,256], index: 0, kind: input, shape index: {}]   ;;  %s945_s1 = inlined_call_operand.hbm [shape: f32[2,4,256], index: 1, kind: input, shape index: {}]   ;;  %s946_s2 = inlined_call_operand.hbm [shape: f32[2,1,128], index: 2, kind: output, shape index: {}]  }
   0x1   :  { %9 = vsyncpa [#allocation4 + $0x1], 0 }
   0x2   :  { %10 = vsyncpa [#allocation7], 0 }
   0x3   :  { %12 = vsyncpa [#allocation7 + $0x1], 0 }
   0x4   :  { %13 = vsyncpa [#allocation5], 0 }
   0x5   :  { %15 = vsyncpa [#allocation5 + $0x1], 0  ;;  %s790_s9 = smov 0   ;;  %s792_s10 = smov 0  }
   0x6   :  { %s794_s11 = smov 0   ;;  %s796_s12 = smov 0  }
   0x7   :  { %s798_s13 = smov 0   ;;  %s800_s14 = smov 0  }
   0x8 LB: > { %s527_s15 = sadd.s32 4294967295, %s772_s14   ;;  %s528_s16 = sadd.s32 4294967294, %s772_s14   ;;  %s772_s14 = sphi %s800_s14, %s21_s14   ;;  %s768_s13 = sphi %s798_s13, %s957_s13   ;;  %s764_s12 = sphi %s796_s12, %s956_s12   ;;  %s760_s11 = sphi %s794_s11, %s955_s11   ;;  %s756_s10 = sphi %s792_s10, %s954_s10   ;;  %s752_s9 = sphi %s790_s9, %s953_s9  }
   0x9   : > { %s33_s17 = sadd.s32 1, %s768_s13  ;;  %s42_s18 = sadd.s32 1, %s760_s11 }
   0xa   : > { %p35_p0 = scmp.ge.s32.totalorder %s33_s17, 2  ;;  %p49_p1 = scmp.ne.s32.totalorder %s760_s11, %s756_s10 }
   0xb   : > { %p50_p2 = scmp.eq.s32.totalorder %s772_s14, 0  ;;  %p55_p3 = scmp.ne.s32.totalorder %s756_s10, %s752_s9 }
   0xc   : > { %s959_s17 = smov (%p35_p0, %s33_s17), 0  ;;  %p56_p5 = scmp.eq.s32.totalorder %s527_s15, 0 }
   0xd   : > { %p831_p4 = por %p50_p2, %p49_p1  ;;  %s37_s20 = ssub.s32 %s768_s13, %s959_s17 }
   0xe   : > { %p107_p6 = scmp.eq.s32.totalorder %s527_s15, 1  ;;  %p40_p7 = scmp.eq.s32.totalorder %s37_s20, 0 }
   0xf   : > { %p837_p8 = por %p56_p5, %p55_p3  ;;  %p113_p10 = scmp.eq.s32.totalorder %s528_s16, 1 }
  0x10   : > { %p841_p9 = por %p107_p6, %p49_p1  ;;  %p530_p12 = scmp.ge.s32.totalorder %s772_s14, 2 }
  0x11   : > { %s846_s23 = scalar_select %p40_p7, %s760_s11, %s42_s18  }
  0x12   : > { %p848_p11 = por %p113_p10, %p55_p3  ;;  %p563_p13 = scmp.lt.s32.totalorder %s772_s14, 2 }
  0x13   : > { %s133_s25 = sand.u32 1, %s760_s11   ;;  %s542_s27 = sshll.u32 %s768_s13, 3 }
  0x14   : > { %s531_s26 = sshll.u32 %s133_s25, 3  ;;  %s144_s30 = scalar_lea.hbm %s944_s0, %s542_s27 }
  0x15   : > { %s137_s3 = scalar_lea.vmem [#allocation3], %s531_s26  ;;  %s146_s5 = sshll.u32 %s144_s30, 4  ;;  %s147_s5 = int_to_ptr.hbm [resolvable:$true] %s146_s5 }
  0x16   : > { %s148_s4 = sshll.u32 %s137_s3, 4  ;;  %p553_p0 = pnand %p563_p13, %p831_p4  ;;  %s149_s4 = int_to_ptr.vmem [resolvable:$true] %s148_s4 }
  0x17   : > { %p537_p1 = scmp.ge.s32.totalorder %s772_s14, 1  ;;  %p175_p2 = scmp.lt.s32.totalorder %s772_s14, 3 }
  0x18   : > { %s134_s6 = scalar_lea.sflag [#allocation4], %s133_s25  ;;  %s166_s15 = scalar_lea.hbm %s945_s1, %s542_s27 }
  0x19   : > { %555 = dma.hbm_to_vmem [thread:$0]  (!%p553_p0), %s147_s5, 128, %s149_s4, %s134_s6  }
  0x1a   : > { %p176_p3 = pnand %p537_p1, %p175_p2  ;;  %s159_s16 = scalar_lea.vmem [#allocation6], %s531_s26 }
  0x1b   : > { %s170_s18 = sshll.u32 %s159_s16, 4  ;;  %s168_s20 = sshll.u32 %s166_s15, 4  ;;  %s171_s18 = int_to_ptr.vmem [resolvable:$true] %s170_s18  ;;  %s169_s20 = int_to_ptr.hbm [resolvable:$true] %s168_s20 }
  0x1c   : > { %s156_s28 = scalar_lea.sflag [#allocation7], %s133_s25  ;;  %179 = sbr.rel (%p176_p3) target bundleno = 356 (0x164), region = 28 }
  0x1d   : > { %558 = dma.hbm_to_vmem [thread:$0]  (!%p553_p0), %s169_s20, 128, %s171_s18, %s156_s28  }
  0x1e   : > { %s867_s19 = sand.u32 (!%p176_p3), 1, %s756_s10  }
  0x1f   : > { %s538_s29 = sshll.u32 (!%p176_p3), %s867_s19, 3  ;;  %s182_s30 = scalar_lea.sflag (!%p176_p3), [#allocation4], %s867_s19 }
  0x20   : > { %s185_s3 = scalar_lea.vmem (!%p176_p3), [#allocation3], %s538_s29 }
  0x21   : > { %739 = dma.done.wait (%p837_p8), %s182_s30, 128  }
  0x22   : > { %741 = vsyncadd (%p837_p8), %s182_s30, 4294967168  ;;  %s192_s26 = scalar_lea.sflag [#allocation7], %s867_s19  ;;  %s195_s25 = scalar_lea.vmem [#allocation6], %s538_s29 }
  0x23   : > { %743 = dma.done.wait (%p837_p8), %s192_s26, 128  }
  0x24   : > { %745 = vsyncadd (%p837_p8), %s192_s26, 4294967168  ;;  %v227_v0 = vlaneseq  ;;  %v774_v2 = vmov 0.0   ;;  %v232_v3 = vld [vmem:[%s185_s3] sm:$0xff]  ;;  %v233_v4 = vld [vmem:[%s195_s25] sm:$0xff]  ;;  %vm240_vm1 = vcmask 1043456   ;;  %vm379_vm2 = vcmask 1040384   ;;  %s420_s4 = scalar_lea.hbm %s946_s2, %s764_s12 }
  0x25   : > { %235 = vst [vmem:[#allocation1] ss:$2 sm:$0xff] %v232_v3  ;;  %s220_s5 = scalar_lea.vmem [#allocation8], %s867_s19  ;;  %s424_s7 = sshll.u32 %s420_s4, 4  ;;  %s425_s7 = int_to_ptr.hbm [resolvable:$true] %s424_s7 }
  0x26   : > { %vm880_vm0 = vcmp.lt.s32.totalorder %v227_v0, 256  ;;  %s422_s6 = sshll.u32 %s220_s5, 4  ;;  %s412_s15 = scalar_lea.sflag [#allocation5], %s867_s19  ;;  %s423_s6 = int_to_ptr.vmem [resolvable:$true] %s422_s6 }
  0x27   : > { %231 = vst.msk [vmem:[#allocation2] sm:$0x3] %vm880_vm0, %v774_v2  ;;  %s700_s16 = sshra.s32 %s425_s7, 4  ;;  %s706_s12 = scalar_lea.hbm %s946_s2, 2  ;;  %s701_s16 = int_to_ptr.hbm [resolvable:$true] %s700_s16 }
  0x28   : > { %s702_s18 = scalar_lea.hbm %s701_s16, 1  ;;  %p707_p7 = scmp.lt.s32.totalorder %s701_s16, %s946_s2 }
  0x29   : > { %p703_p4 = scmp.ne.s32.totalorder %s701_s16, %s702_s18  ;;  %p708_p8 = scmp.lt.s32.totalorder %s706_s12, %s702_s18 }
  0x2b   : > { %p704_p5 = pnand %p703_p4, %p841_p9  ;;  %p709_p10 = por %p708_p8, %p707_p7 }
  0x2c   : > { %v236_v5 = vld.sshfl [vmem:[#allocation1] sm:$0xff pattern:$0x75316420]  ;;  %v237_v6 = vld.sshfl [vmem:[#allocation1 + $0x8] sm:$0xff pattern:$0x75316420] }
  0x2d   : > { %v241_v7 = vsel %vm240_vm1, %v236_v5, -inf  ;;  %v248_v8 = vsel %vm240_vm1, %v237_v6, -inf  ;;  %256 = vst [vmem:[#allocation1] ss:$2 sm:$0xff] %v233_v4  ;;  %p705_p6 = pneg %p704_p5 }
  0x2e   : > { %v242_v9 = vrot.slane %v241_v7, 4  ;;  %v249_v10 = vrot.slane %v248_v8, 4 }
  0x2f   : > { %p710_p13 = pnand %p709_p10, %p705_p6 }
  0x30   : > { %v243_v11 = vmax.f32 %v241_v7, %v242_v9  ;;  %v250_v12 = vmax.f32 %v248_v8, %v249_v10 }
  0x32   : > { %v244_v13 = vrot.slane %v243_v11, 2  ;;  %v251_v14 = vrot.slane %v250_v12, 2 }
  0x34   : > { %v245_v15 = vmax.f32 %v243_v11, %v244_v13  ;;  %v252_v16 = vmax.f32 %v250_v12, %v251_v14  ;;  %v257_v17 = vld.sshfl [vmem:[#allocation1] sm:$0xff pattern:$0x75316420]  ;;  %v258_v18 = vld.sshfl [vmem:[#allocation1 + $0x8] sm:$0xff pattern:$0x75316420] }
  0x35   : > { %v261_v19 = vsel %vm240_vm1, %v257_v17, -inf  ;;  %v268_v20 = vsel %vm240_vm1, %v258_v18, -inf }
  0x36   : > { %v246_v21 = vrot.slane %v245_v15, 1  ;;  %v253_v22 = vrot.slane %v252_v16, 1  ;;  %v262_v23 = vrot.slane %v261_v19, 4  ;;  %v269_v24 = vrot.slane %v268_v20, 4 }
  0x38   : > { %v247_v25 = vmax.f32 %v245_v15, %v246_v21  ;;  %v254_v26 = vmax.f32 %v252_v16, %v253_v22  ;;  %v263_v27 = vmax.f32 %v261_v19, %v262_v23  ;;  %v270_v28 = vmax.f32 %v268_v20, %v269_v24 }
  0x3a   : > { %v264_v29 = vrot.slane %v263_v27, 2  ;;  %v271_v30 = vrot.slane %v270_v28, 2  ;;  %v277_v31 = vrot.slane %v254_v26, 4 }
  0x3c   : > { %v265_v32 = vmax.f32 %v263_v27, %v264_v29  ;;  %v272_v33 = vmax.f32 %v270_v28, %v271_v30  ;;  %v278_v34 = vsel %vm240_vm1, %v247_v25, %v277_v31 }
  0x3d   : > { %v891_v35 = vsub.f32 %v232_v3, %v278_v34 }
  0x3e   : > { %v266_v36 = vrot.slane %v265_v32, 1  ;;  %v273_v37 = vrot.slane %v272_v33, 1 }
  0x3f   : > { %v287_v38 = vmul.f32 1.442695, %v891_v35 }
  0x40   : > { %v267_v39 = vmax.f32 %v265_v32, %v266_v36  ;;  %v274_v40 = vmax.f32 %v272_v33, %v273_v37 }
  0x41   : > { %614 = vpow2.f32 %v287_v38 }
  0x42   : > { %v283_v41 = vrot.slane %v274_v40, 4 }
  0x44   : > { %v284_v42 = vsel %vm240_vm1, %v267_v39, %v283_v41 }
  0x45   : > { %v286_v43 = vsub.f32 %v233_v4, %v284_v42 }
  0x47   : > { %v615_v44 = vpop.eup %614  ;;  %v309_v45 = vmul.f32 1.442695, %v286_v43  ;;  %v345_v30 = vsub.f32 %v286_v43, %v891_v35 }
  0x48   : > { %290 = vst [vmem:[#allocation1] ss:$2 sm:$0xff] %v615_v44 }
  0x49   : > { %616 = vpow2.f32 %v309_v45 }
  0x4f   : > { %v617_v46 = vpop.eup %616  ;;  %v291_v47 = vld.sshfl [vmem:[#allocation1] sm:$0xff pattern:$0x75316420]  ;;  %v292_v48 = vld.sshfl [vmem:[#allocation1 + $0x8] sm:$0xff pattern:$0x75316420] }
  0x50   : > { %312 = vst [vmem:[#allocation1] ss:$2 sm:$0xff] %v617_v46  ;;  %v295_v49 = vsel %vm240_vm1, %v291_v47, 0.0  ;;  %v302_v52 = vsel %vm240_vm1, %v292_v48, 0.0 }
  0x51   : > { %v296_v57 = vrot.slane %v295_v49, 4  ;;  %v303_v58 = vrot.slane %v302_v52, 4 }
  0x53   : > { %v297_v63 = vadd.f32 %v296_v57, %v295_v49  ;;  %v304_v0 = vadd.f32 %v303_v58, %v302_v52 }
  0x55   : > { %v298_v6 = vrot.slane %v297_v63, 2  ;;  %v305_v7 = vrot.slane %v304_v0, 2 }
  0x57   : > { %v313_v50 = vld.sshfl [vmem:[#allocation1] sm:$0xff pattern:$0x75316420]  ;;  %v314_v51 = vld.sshfl [vmem:[#allocation1 + $0x8] sm:$0xff pattern:$0x75316420]  ;;  %v299_v10 = vadd.f32 %v298_v6, %v297_v63  ;;  %v306_v11 = vadd.f32 %v305_v7, %v304_v0 }
  0x58   : > { %v317_v53 = vsel %vm240_vm1, %v313_v50, 0.0  ;;  %v324_v54 = vsel %vm240_vm1, %v314_v51, 0.0 }
  0x59   : > { %v318_v55 = vrot.slane %v317_v53, 4  ;;  %v325_v56 = vrot.slane %v324_v54, 4  ;;  %v300_v12 = vrot.slane %v299_v10, 1  ;;  %v307_v14 = vrot.slane %v306_v11, 1 }
  0x5b   : > { %v319_v59 = vadd.f32 %v318_v55, %v317_v53  ;;  %v326_v60 = vadd.f32 %v325_v56, %v324_v54  ;;  %v301_v18 = vadd.f32 %v300_v12, %v299_v10  ;;  %v308_v20 = vadd.f32 %v307_v14, %v306_v11  ;;  %v375_v53 = vld [vmem:[#allocation2] sm:$0x3] }
  0x5d   : > { %v320_v61 = vrot.slane %v319_v59, 2  ;;  %v327_v62 = vrot.slane %v326_v60, 2 }
  0x5f   : > { %v321_v2 = vadd.f32 %v320_v61, %v319_v59  ;;  %v328_v3 = vadd.f32 %v327_v62, %v326_v60 }
  0x61   : > { %v322_v4 = vrot.slane %v321_v2, 1  ;;  %v329_v5 = vrot.slane %v328_v3, 1 }
  0x63   : > { %v323_v8 = vadd.f32 %v322_v4, %v321_v2  ;;  %v330_v9 = vadd.f32 %v329_v5, %v328_v3 }
  0x65   : > { %618 = vrcp.f32 %v323_v8 }
  0x66   : > { %620 = vrcp.f32 %v330_v9 }
  0x6b   : > { %v619_v13 = vpop.eup %618 }
  0x6c   : > { %v621_v15 = vpop.eup %620  ;;  %v333_v16 = vmul.f32 %v619_v13, %v323_v8 }
  0x6d   : > { %v334_v17 = vmul.f32 %v621_v15, %v330_v9 }
  0x6e   : > { %v335_v19 = vsub.f32 2.0, %v333_v16 }
  0x6f   : > { %v336_v21 = vsub.f32 2.0, %v334_v17 }
  0x70   : > { %v337_v22 = vmul.f32 %v619_v13, %v335_v19 }
  0x71   : > { %v338_v23 = vmul.f32 %v621_v15, %v336_v21 }
  0x72   : > { %v339_v24 = vmul.f32 %v337_v22, %v301_v18 }
  0x73   : > { %v340_v25 = vmul.f32 %v338_v23, %v308_v20 }
  0x74   : > { %622 = vlog2.f32 %v339_v24 }
  0x75   : > { %624 = vlog2.f32 %v340_v25 }
  0x7a   : > { %v623_v26 = vpop.eup %622 }
  0x7b   : > { %v625_v27 = vpop.eup %624  ;;  %v342_v28 = vmul.f32 0.6931472, %v623_v26 }
  0x7c   : > { %v344_v29 = vmul.f32 0.6931472, %v625_v27 }
  0x7e   : > { %v348_v31 = vrot.slane %v344_v29, 4 }
  0x80   : > { %v349_v32 = vsel %vm240_vm1, %v342_v28, %v348_v31 }
  0x81   : > { %v351_v33 = vadd.f32 %v349_v32, %v345_v30 }
  0x83   : > { %v352_v34 = vmul.f32 %v617_v46, %v351_v33 }
  0x85   : > { %354 = vst [vmem:[#allocation1] ss:$2 sm:$0xff] %v352_v34 }
  0x8c   : > { %v355_v36 = vld.sshfl [vmem:[#allocation1] sm:$0xff pattern:$0x75316420]  ;;  %v356_v37 = vld.sshfl [vmem:[#allocation1 + $0x8] sm:$0xff pattern:$0x75316420] }
  0x8d   : > { %v359_v38 = vsel %vm240_vm1, %v355_v36, 0.0  ;;  %v366_v39 = vsel %vm240_vm1, %v356_v37, 0.0 }
  0x8e   : > { %v360_v40 = vrot.slane %v359_v38, 4  ;;  %v367_v41 = vrot.slane %v366_v39, 4 }
  0x90   : > { %v361_v42 = vadd.f32 %v360_v40, %v359_v38  ;;  %v368_v44 = vadd.f32 %v367_v41, %v366_v39 }
  0x92   : > { %v362_v45 = vrot.slane %v361_v42, 2  ;;  %v369_v47 = vrot.slane %v368_v44, 2 }
  0x94   : > { %v363_v48 = vadd.f32 %v362_v45, %v361_v42  ;;  %v370_v35 = vadd.f32 %v369_v47, %v368_v44 }
  0x96   : > { %v364_v43 = vrot.slane %v363_v48, 1  ;;  %v371_v49 = vrot.slane %v370_v35, 1 }
  0x98   : > { %v365_v50 = vadd.f32 %v364_v43, %v363_v48  ;;  %v372_v51 = vadd.f32 %v371_v49, %v370_v35 }
  0x9a   : > { %v373_v46 = vmul.f32 %v365_v50, %v337_v22  ;;  %v374_v52 = vmul.f32 %v372_v51, %v338_v23 }
  0x9c   : > { %v378_v54 = vrot.slane %v374_v52, 7 }
  0x9e   : > { %v380_v55 = vsel %vm379_vm2, %v373_v46, %v378_v54 }
  0x9f   : > { %v382_v56 = vadd.f32 %v380_v55, %v375_v53 }
  0xa1   : > { %387 = vst.msk [vmem:[#allocation2] sm:$0x3] %vm880_vm0, %v382_v56 }
  0xa8   : > { %v391_v57 = vld [vmem:[#allocation2] sm:$0x3] }
  0xa9   : > { %v393_v58 = vperm.slane %v391_v57, 0  ;;  %v394_v59 = vperm.slane %v391_v57, 1 }
  0xab   : > { %v397_v60 = vsel %vm379_vm2, %v393_v58, 0.0  ;;  %v398_v61 = vsel %vm379_vm2, %v394_v59, 0.0 }
  0xac   : > { %v399_v62 = vadd.f32 %v398_v61, %v397_v60 }
  0xae   : > { %400 = vadd.xlane.f32.xlu0 %v399_v62 }
 0x121   : > { %v401_v63 = vpop.xlane.xlu0 %400 }
 0x122   : > { %v402_v0 = vrot.slane %v401_v63, 4 }
 0x124   : > { %v403_v2 = vadd.f32 %v402_v0, %v401_v63 }
 0x126   : > { %v404_v3 = vrot.slane %v403_v2, 2 }
 0x128   : > { %v405_v4 = vadd.f32 %v404_v3, %v403_v2 }
 0x12a   : > { %v406_v5 = vrot.slane %v405_v4, 1 }
 0x12c   : > { %v407_v6 = vadd.f32 %v406_v5, %v405_v4 }
 0x12e   : > { %544 = vpush %v407_v6 }
 0x15f   : > { %s545_s8 = spop %544 }
 0x160   : > { %v409_v1 = vstv %s545_s8 }
 0x161   : > { %410 = vst [vmem:[%s220_s5] sm:$0x1] %v409_v1 }
 0x162   : > { %713 = shalt.err (!%p710_p13)
}
 0x163   : > { %550 = dma.vmem_to_hbm [thread:$0]  (%p841_p9), %s423_s6, 16, %s425_s7, %s412_s15  }
 0x164 PF: > { %s436_s19 = sand.u32 1, %s752_s9   ;;  %p560_p0 = pnand %p530_p12, %p848_p11 }
 0x165   : > { %s437_s3 = scalar_lea.sflag [#allocation5], %s436_s19 }
 0x166   : > { %p561_p1 = pneg %p560_p0 }
 0x168   : > { %747 = dma.done.wait (%p561_p1), %s437_s3, 16  }
 0x169   : > { %749 = vsyncadd (%p561_p1), %s437_s3, 4294967280  ;;  %s21_s14 = sadd.s32 1, %s772_s14   ;;  %s953_s9 = smov %s756_s10 }
 0x16a   : > { %p18_p2 = scmp.ge.s32.totalorder %s21_s14, 4   ;;  %s954_s10 = smov %s760_s11 }
 0x16b   : > { %s955_s11 = smov %s846_s23  ;;  %s956_s12 = smov %s768_s13 }
 0x16c   : > { %s957_s13 = smov %s959_s17  ;;  %20 = sbr.rel (!%p18_p2) target bundleno = 8 (0x8), region = 94 }
 0x171   :  { %442 = vsyncpa [#allocation4], 1 }
 0x172   :  { %444 = vsyncpa [#allocation4 + $0x1], 1 }
 0x173   :  { %445 = vsyncpa [#allocation7], 1 }
 0x174   :  { %447 = vsyncpa [#allocation7 + $0x1], 1 }
 0x175   :  { %448 = vsyncpa [#allocation5], 1 }
 0x176   :  { %450 = vsyncpa [#allocation5 + $0x1], 1 }

</bundles_post_ra>
